<compile_context>
chip_gen: v5e
topology: v5e:2x2
jax: 0.10.0
libtpu: 0.0.40
codegen_flags: <defaults>
</compile_context>

<pallas_src>
import math
import jax
import jax.numpy as jnp
from jax.experimental import pallas as pl
from jax.experimental.pallas import tpu as pltpu


def _classifier_kernel(b_ref, w_ref, x_ref, mask_ref, out_ref):
    # b_ref:    SMEM (1,)          f32   bias
    # w_ref:    VMEM (1, H)        input dtype (constant index_map -> DMA'd once, resident)
    # x_ref:    VMEM (TILE_M, H)   input dtype (bf16/f32), double-buffered by Pallas
    # mask_ref: VMEM (TILE_M, 1)   f32
    # out_ref:  VMEM (TILE_M, 1)   f32
    x = x_ref[...].astype(jnp.float32)   # upcast in-register (v5e VPU/EUP have no bf16 path)
    w = w_ref[...].astype(jnp.float32)   # (1, H) broadcasts over the row tile (2-D, no 3-D bcast)
    h = jnp.sum(x * w, axis=-1, keepdims=True) + b_ref[0]        # (TILE_M, 1) f32
    out_ref[...] = jax.nn.sigmoid(h) * mask_ref[...]             # sigmoid * mask_cls.float()


def classifier_forward(x, mask_cls, weight, bias, *, max_tile_m=1024):
    """x: [B, S, H] (f32 or bf16); mask_cls: [B, S]; weight: [1, H]; bias: [1] -> [B, S] f32."""
    B, S, H = x.shape
    M = B * S

    x2 = x.reshape(M, H)                                   # keep native dtype on the wire
    mask2 = mask_cls.reshape(M, 1).astype(jnp.float32)     # tiny (B*S elems) -> cast is negligible
    w2 = weight.reshape(1, H).astype(x.dtype)              # tiny (H elems)
    b1 = bias.reshape(1).astype(jnp.float32)

    # Row-tile size: keep the double-buffered x tile <= ~8 MiB so it fits comfortably in
    # v7x's 64 MiB (32 MiB scoped) VMEM as well as v5e/v6e.
    itemsize = jnp.dtype(x.dtype).itemsize
    budget = 8 * 1024 * 1024
    tm = max(8, min(max_tile_m, budget // max(1, 2 * H * itemsize)))
    tm = (tm // 8) * 8
    if M <= tm:
        tm = M                                             # single block; full-dim block is legal
    grid = (pl.cdiv(M, tm),)                               # ragged last block handled by Pallas
    # TODO(synk): if H grows past ~8-16K per row tile, add a trailing "arbitrary" K grid axis
    # with an f32 VMEM accumulator (pl.when init/finalize) instead of shrinking TILE_M further.

    out = pl.pallas_call(
        _classifier_kernel,
        out_shape=jax.ShapeDtypeStruct((M, 1), jnp.float32),
        grid=grid,
        in_specs=[
            pl.BlockSpec(memory_space=pltpu.MemorySpace.SMEM),   # bias scalar
            pl.BlockSpec((1, H), lambda i: (0, 0)),              # weight: resident across grid
            pl.BlockSpec((tm, H), lambda i: (i, 0)),             # x row tile (pipelined)
            pl.BlockSpec((tm, 1), lambda i: (i, 0)),             # mask row tile
        ],
        out_specs=pl.BlockSpec((tm, 1), lambda i: (i, 0)),
        compiler_params=pltpu.CompilerParams(
            dimension_semantics=("parallel",),                   # lets v7x shard rows across 2 TCs
            vmem_limit_bytes=32 * 1024 * 1024,
        ),
    )(b1, w2, x2, mask2)
    return out.reshape(B, S)


def init_classifier_params(hidden_size, key):
    # Mimics nn.Linear default init (uniform +-1/sqrt(fan_in)).
    k_w, k_b = jax.random.split(key)
    bound = 1.0 / math.sqrt(hidden_size)
    weight = jax.random.uniform(k_w, (1, hidden_size), jnp.float32, -bound, bound)
    bias = jax.random.uniform(k_b, (1,), jnp.float32, -bound, bound)
    return weight, bias


def classifier_reference(x, mask_cls, weight, bias):
    h = jnp.einsum("bsh,oh->bso", x.astype(jnp.float32), weight.astype(jnp.float32))[..., 0]
    h = h + bias.astype(jnp.float32)[0]
    return jax.nn.sigmoid(h) * mask_cls.astype(jnp.float32)


if __name__ == "__main__":
    key = jax.random.PRNGKey(0)
    k_x, k_m, k_p, k_x2, k_m2 = jax.random.split(key, 5)

    # --- test 1: small f32 case (matches module defaults) ---
    B, S, H = 2, 8, 32
    x = jax.random.normal(k_x, (B, S, H), jnp.float32)
    mask_cls = (jax.random.uniform(k_m, (B, S)) > 0.3).astype(jnp.int32)
    weight, bias = init_classifier_params(H, k_p)

    out = jax.block_until_ready(classifier_forward(x, mask_cls, weight, bias))
    ref = classifier_reference(x, mask_cls, weight, bias)
    assert out.shape == (B, S)
    assert jnp.allclose(out, ref, atol=1e-5, rtol=1e-5), "f32 mismatch vs reference"

    # --- test 2: bf16 input on the wire + multi-tile grid with a ragged last block ---
    B2, S2, H2 = 3, 50, 64
    x2 = jax.random.normal(k_x2, (B2, S2, H2), jnp.float32).astype(jnp.bfloat16)
    mask2 = (jax.random.uniform(k_m2, (B2, S2)) > 0.3).astype(jnp.int32)
    w2, b2 = init_classifier_params(H2, k_p)
    w2_bf16 = w2.astype(jnp.bfloat16)

    out2 = jax.block_until_ready(
        classifier_forward(x2, mask2, w2_bf16, b2, max_tile_m=64))   # grid=(3,), ragged tail
    ref2 = classifier_reference(x2, mask2, w2_bf16, b2)              # same upcast-to-f32 math
    assert out2.shape == (B2, S2)
    assert jnp.allclose(out2, ref2, atol=1e-3, rtol=1e-3), "bf16 mismatch vs reference"

    print("KERNEL_OK")
</pallas_src>

<mosaic_0001>
module attributes {stable_mosaic.version = 11 : i64} {
  func.func @_classifier_kernel(%arg0: i32, %arg1: memref<1xf32, #tpu.memory_space<smem>>, %arg2: memref<1x32xf32, #tpu.memory_space<vmem>>, %arg3: memref<16x32xf32, #tpu.memory_space<vmem>>, %arg4: memref<16x1xf32, #tpu.memory_space<vmem>>, %arg5: memref<16x1xf32, #tpu.memory_space<vmem>>) attributes {dimension_semantics = [#tpu.dimension_semantics<parallel>], iteration_bounds = array<i64: 1>, scalar_prefetch = 0 : i64, scratch_operands = 0 : i64, tpu.core_type = #tpu.core_type<tc>, window_params = [{transform_indices = @transform_0, window_bounds = array<i64: 1>}, {pipeline_mode = #tpu.pipeline_mode<synchronous>, transform_indices = @transform_1, window_bounds = array<i64: 1, 32>}, {transform_indices = @transform_2, window_bounds = array<i64: 16, 32>}, {transform_indices = @transform_3, window_bounds = array<i64: 16, 1>}, {transform_indices = @transform_4, window_bounds = array<i64: 16, 1>}]} {
    %c0 = arith.constant 0 : index
    %c0_0 = arith.constant 0 : index
    %0 = vector.load %arg3[%c0, %c0_0] : memref<16x32xf32, #tpu.memory_space<vmem>>, vector<16x32xf32>
    %c0_1 = arith.constant 0 : index
    %c0_2 = arith.constant 0 : index
    %1 = vector.load %arg2[%c0_1, %c0_2] : memref<1x32xf32, #tpu.memory_space<vmem>>, vector<1x32xf32>
    %2 = vector.broadcast %1 : vector<1x32xf32> to vector<16x32xf32>
    %3 = arith.mulf %0, %2 : vector<16x32xf32>
    %cst = arith.constant dense<0.000000e+00> : vector<16xf32>
    %4 = vector.multi_reduction <add>, %3, %cst [1] : vector<16x32xf32> to vector<16xf32>
    %5 = vector.shape_cast %4 : vector<16xf32> to vector<16x1xf32>
    %c0_3 = arith.constant 0 : index
    %6 = memref.load %arg1[%c0_3] : memref<1xf32, #tpu.memory_space<smem>>
    %7 = vector.broadcast %6 : f32 to vector<16x1xf32>
    %8 = arith.addf %5, %7 : vector<16x1xf32>
    %9 = arith.negf %8 : vector<16x1xf32>
    %10 = math.exp %9 : vector<16x1xf32>
    %cst_4 = arith.constant 1.000000e+00 : f32
    %11 = vector.broadcast %cst_4 : f32 to vector<16x1xf32>
    %12 = arith.addf %11, %10 : vector<16x1xf32>
    %13 = arith.divf %11, %12 : vector<16x1xf32>
    %c0_5 = arith.constant 0 : index
    %c0_6 = arith.constant 0 : index
    %14 = vector.load %arg4[%c0_5, %c0_6] : memref<16x1xf32, #tpu.memory_space<vmem>>, vector<16x1xf32>
    %15 = arith.mulf %13, %14 : vector<16x1xf32>
    %c0_7 = arith.constant 0 : index
    %c0_8 = arith.constant 0 : index
    %16 = vector.load %arg5[%c0_7, %c0_8] : memref<16x1xf32, #tpu.memory_space<vmem>>, vector<16x1xf32>
    tpu.vector_store %arg5[%c0_7, %c0_8], %15 {strides = array<i32>} : memref<16x1xf32, #tpu.memory_space<vmem>>, vector<16x1xf32>,
    return
  }
  func.func @transform_0(%arg0: i32) -> i32 {
    %c0_i32 = arith.constant 0 : i32
    %c0_i32_0 = arith.constant 0 : i32
    return %c0_i32 : i32
  }
  func.func @transform_1(%arg0: i32) -> (i32, i32) {
    %c0_i32 = arith.constant 0 : i32
    %c0_i32_0 = arith.constant 0 : i32
    %c0_i32_1 = arith.constant 0 : i32
    return %c0_i32, %c0_i32_0 : i32, i32
  }
  func.func @transform_2(%arg0: i32) -> (i32, i32) {
    %c0_i32 = arith.constant 0 : i32
    %c0_i32_0 = arith.constant 0 : i32
    return %arg0, %c0_i32 : i32, i32
  }
  func.func @transform_3(%arg0: i32) -> (i32, i32) {
    %c0_i32 = arith.constant 0 : i32
    %c0_i32_0 = arith.constant 0 : i32
    return %arg0, %c0_i32 : i32, i32
  }
  func.func @transform_4(%arg0: i32) -> (i32, i32) {
    %c0_i32 = arith.constant 0 : i32
    %c0_i32_0 = arith.constant 0 : i32
    return %arg0, %c0_i32 : i32, i32
  }
}

</mosaic_0001>

<bundles_post_ra>
// kernel: tpu_custom_call.1
= control target key start
LH: loop header
LB: loop body
LE: loop exit
PB: predicated region body
PF: predicated region fallthrough
CT: control target
= control target key end

     0   :  { %vm26_vm0 = vcmask 261120   ;;  %vm79_vm5 = vcmask 7168   ;;  %s148_s1 = inlined_call_operand.vmem [shape: f32[1,32], index: 1, kind: input, shape index: {}]   ;;  %s149_s2 = inlined_call_operand.vmem [shape: f32[16,32], index: 2, kind: input, shape index: {}]   ;;  %s150_s0 = inlined_call_operand.<no memory space> [shape: f32[1], index: 0, kind: input, shape index: {}]   ;;  %s151_s3 = inlined_call_operand.vmem [shape: f32[16,1], index: 3, kind: input, shape index: {}]   ;;  %s152_s4 = inlined_call_operand.vmem [shape: f32[16,1], index: 4, kind: output, shape index: {}]  }
   0x1   :  { %v18_v0 = vld [vmem:[%s149_s2] sm:$0xff]  ;;  %v19_v3 = vld [vmem:[%s149_s2 + $0x8] sm:$0xff]  ;;  %v34_v7 = vstv %s150_s0 }
   0x2   :  { %v88_v1 = vld [vmem:[%s148_s1] ss:$0 sm:$0xff]  ;;  %v76_v37 = vld [vmem:[%s151_s3 + $0x8] sm:$0xff] }
   0x3   :  { %v24_v2 = vmul.f32 %v88_v1, %v18_v0  ;;  %v25_v5 = vmul.f32 %v88_v1, %v19_v3  ;;  %v75_v26 = vld [vmem:[%s151_s3] sm:$0xff] }
   0x5   :  { %v27_v4 = vsel %vm26_vm0, %v24_v2, 0.0  ;;  %v30_v6 = vsel %vm26_vm0, %v25_v5, 0.0 }
   0x6   :  { %28 = vadd.xlane.f32.xlu0 %v27_v4 }
   0xe   :  { %31 = vadd.xlane.f32.xlu0 %v30_v6 }
  0x79   :  { %v29_v8 = vpop.xlane.xlu0 %28 }
  0x7a   :  { %v35_v9 = vadd.f32 %v34_v7, %v29_v8 }
  0x7c   :  { %v86_v10 = vmul.f32 -1.442695, %v35_v9 }
  0x7e   :  { %89 = vpow2.f32 %v86_v10 }
  0x81   :  { %v32_v11 = vpop.xlane.xlu0 %31 }
  0x82   :  { %v36_v12 = vadd.f32 %v34_v7, %v32_v11 }
  0x84   :  { %v90_v13 = vpop.eup %89  ;;  %v87_v14 = vmul.f32 -1.442695, %v36_v12 }
  0x85   :  { %v43_v15 = vadd.f32 1.0, %v90_v13 }
  0x86   :  { %91 = vpow2.f32 %v87_v14 }
  0x87   :  { %93 = vrcp.f32 %v43_v15  ;;  %v56_v21 = vand.u32 2147483648, %v43_v15  ;;  %v54_v23 = vand.u32 2147483647, %v43_v15  ;;  %vm50_vm2 = vweird.f32 %v43_v15 }
  0x89   :  { %v57_v27 = vor.u32 1.1754944e-38, %v56_v21  ;;  %vm55_vm4 = vcmp.eq.f32.partialorder %v54_v23, 8.507059e+37 }
  0x8c   :  { %v92_v16 = vpop.eup %91 }
  0x8d   :  { %v94_v17 = vpop.eup %93  ;;  %v44_v18 = vadd.f32 1.0, %v92_v16 }
  0x8e   :  { %v46_v19 = vmul.f32 %v94_v17, %v43_v15  ;;  %vm51_vm1 = vweird.f32 %v94_v17 }
  0x8f   :  { %95 = vrcp.f32 %v44_v18  ;;  %vm52_vm3 = vmor %vm50_vm2, %vm51_vm1  ;;  %v71_v33 = vand.u32 2147483648, %v44_v18  ;;  %v69_v35 = vand.u32 2147483647, %v44_v18  ;;  %vm65_vm7 = vweird.f32 %v44_v18 }
  0x90   :  { %v47_v20 = vsub.f32 1.0, %v46_v19 }
  0x91   :  { %v72_v38 = vor.u32 1.1754944e-38, %v71_v33  ;;  %vm70_vm9 = vcmp.eq.f32.partialorder %v69_v35, 8.507059e+37 }
  0x92   :  { %v48_v22 = vmul.f32 %v94_v17, %v47_v20 }
  0x94   :  { %v49_v24 = vadd.f32 %v94_v17, %v48_v22 }
  0x95   :  { %v96_v25 = vpop.eup %95 }
  0x96   :  { %v53_v28 = vsel %vm52_vm3, %v94_v17, %v49_v24  ;;  %v61_v29 = vmul.f32 %v96_v25, %v44_v18  ;;  %vm66_vm6 = vweird.f32 %v96_v25 }
  0x97   :  { %v58_v30 = vsel %vm55_vm4, %v57_v27, %v53_v28  ;;  %vm67_vm8 = vmor %vm65_vm7, %vm66_vm6 }
  0x98   :  { %v77_v31 = vmul.f32 %v75_v26, %v58_v30  ;;  %v62_v32 = vsub.f32 1.0, %v61_v29 }
  0x9a   :  { %80 = vst.msk [vmem:[%s152_s4] sm:$0xff] %vm79_vm5, %v77_v31  ;;  %v63_v34 = vmul.f32 %v96_v25, %v62_v32 }
  0x9c   :  { %v64_v36 = vadd.f32 %v96_v25, %v63_v34 }
  0x9e   :  { %v68_v39 = vsel %vm67_vm8, %v96_v25, %v64_v36 }
  0x9f   :  { %v73_v40 = vsel %vm70_vm9, %v72_v38, %v68_v39 }
  0xa0   :  { %v78_v41 = vmul.f32 %v76_v37, %v73_v40 }
  0xa2   :  { %81 = vst.msk [vmem:[%s152_s4 + $0x8] sm:$0xff] %vm79_vm5, %v78_v41 }

</bundles_post_ra>
